<compile_context>
chip_gen: v7x
topology: tpu7x:2x2x1
jax: 0.10.0
libtpu: 0.0.40
codegen_flags: <defaults>
</compile_context>

<pallas_src>
import jax
import jax.numpy as jnp
from jax.experimental import pallas as pl
from jax.experimental.pallas import tpu as pltpu

IN_FEATURES = 2048
OUT_FEATURES = 10
OUT_PAD = 128                      # pad N=10 -> one full 128-lane group (unmasked vst)
MXU_DTYPE_DEFAULT = jnp.bfloat16   # bf16 MXU inputs + f32 accumulation


def _round_up(n, m):
    return ((n + m - 1) // m) * m


def _default_tm():
    """Generation-aware batch tile (perf review)."""
    try:
        kind = jax.devices()[0].device_kind.lower()
    except Exception:
        return 512
    # v6e / v7x: TM=1024 amortizes the ~0.35us/step overhead; ~18 MiB
    # double-buffered footprint fits the 32 MiB scoped-VMEM default.
    if "v6" in kind or "v7" in kind or "7x" in kind:
        return 1024
    # v5e (16 MiB scoped default) and unknown chips: 512 (~9.5 MiB).
    return 512


def _make_kernel(mxu_dtype):
    def linear_kernel(x_ref, w_ref, b_ref, o_ref):
        # x_ref: (TM, 2048) input dtype; w_ref: (2048, 128) mxu_dtype;
        # b_ref: (1, 128) f32; o_ref: (TM, 128) output dtype.
        x = x_ref[...].astype(mxu_dtype)
        acc = jnp.dot(x, w_ref[...], preferred_element_type=jnp.float32)
        o_ref[...] = (acc + b_ref[...]).astype(o_ref.dtype)
    return linear_kernel


def prepare_params(w, b, mxu_dtype=MXU_DTYPE_DEFAULT):
    """One-time lane padding (10 -> 128) + MXU dtype cast; hoist out of the hot path."""
    w = jnp.asarray(w)
    b = jnp.asarray(b)
    if w.shape == (IN_FEATURES, OUT_FEATURES):
        w_pad = (jnp.zeros((IN_FEATURES, OUT_PAD), mxu_dtype)
                 .at[:, :OUT_FEATURES].set(w.astype(mxu_dtype)))
    elif w.shape == (IN_FEATURES, OUT_PAD):
        w_pad = w.astype(mxu_dtype)
    else:
        raise ValueError(f"unexpected weight shape {w.shape}")
    if b.shape == (OUT_FEATURES,):
        b_pad = (jnp.zeros((1, OUT_PAD), jnp.float32)
                 .at[0, :OUT_FEATURES].set(b.astype(jnp.float32)))
    elif b.shape == (1, OUT_PAD):
        b_pad = b.astype(jnp.float32)
    else:
        raise ValueError(f"unexpected bias shape {b.shape}")
    return w_pad, b_pad


def classifier_net_forward(x, w, b, *, tm=None, mxu_dtype=MXU_DTYPE_DEFAULT,
                           pad_output=False):
    """x: [B, 2048], w: [2048, 10] (or pre-padded [2048, 128]), b: [10] (or [1, 128]).

    Returns [B, 10], or the lane-padded [B, 128] block if pad_output=True
    (columns 10..127 are exact zeros) so the consumer can fuse the slice.
    """
    B = x.shape[0]
    assert x.shape[1] == IN_FEATURES

    w_pad, b_pad = prepare_params(w, b, mxu_dtype)

    if tm is None:
        tm = _default_tm()
    # Keep the batch tile sublane-aligned (8 for 4-byte, 16 for 2-byte dtypes)
    # and no larger than needed for small batches.
    sublane = 8 if x.dtype.itemsize >= 4 else 16
    tm = _round_up(max(1, min(tm, _round_up(B, sublane))), sublane)

    grid = (pl.cdiv(B, tm),)   # ragged last tile is masked by Pallas; no jnp.pad

    # Only lift the scoped-VMEM default if a user-supplied tile actually needs it.
    vmem_est = (2 * tm * IN_FEATURES * x.dtype.itemsize          # x double-buffer
                + 2 * IN_FEATURES * OUT_PAD * w_pad.dtype.itemsize  # resident W
                + 2 * tm * OUT_PAD * x.dtype.itemsize            # out double-buffer
                + 2 * OUT_PAD * 4)                               # bias
    extra_params = {}
    if vmem_est > (28 << 20):
        extra_params["vmem_limit_bytes"] = int(vmem_est + (8 << 20))

    out = pl.pallas_call(
        _make_kernel(mxu_dtype),
        out_shape=jax.ShapeDtypeStruct((B, OUT_PAD), x.dtype),
        grid_spec=pltpu.PrefetchScalarGridSpec(
            num_scalar_prefetch=0,
            grid=grid,
            in_specs=[
                # x: one batch tile per grid step -> pipelined HBM->VMEM DMA.
                pl.BlockSpec((tm, IN_FEATURES), lambda i: (i, 0)),
                # W and bias: constant block index -> fetched once, VMEM-resident.
                pl.BlockSpec((IN_FEATURES, OUT_PAD), lambda i: (0, 0)),
                pl.BlockSpec((1, OUT_PAD), lambda i: (0, 0)),
            ],
            out_specs=pl.BlockSpec((tm, OUT_PAD), lambda i: (i, 0)),
        ),
        compiler_params=pltpu.CompilerParams(
            # Independent batch tiles. On v7x, if xprof shows one idle core,
            # switch to pltpu.CORE_PARALLEL to force 2-TC sharding.
            dimension_semantics=("parallel",),
            **extra_params,
        ),
        cost_estimate=pl.CostEstimate(
            flops=2 * B * IN_FEATURES * OUT_PAD,
            transcendentals=0,
            bytes_accessed=(B * IN_FEATURES * x.dtype.itemsize       # x (dominant)
                            + IN_FEATURES * OUT_PAD * w_pad.dtype.itemsize
                            + B * OUT_PAD * x.dtype.itemsize),
        ),
    )(x, w_pad, b_pad)

    if pad_output:
        return out
    return out[:, :OUT_FEATURES]


def init_params(key):
    # Deterministic synthetic init matching nn.Linear(2048, 10) default init.
    kw, kb = jax.random.split(key)
    bound = 1.0 / (IN_FEATURES ** 0.5)
    # PyTorch stores weight as [out, in]; keep it transposed as [in, out]
    # so the kernel computes x @ w directly.
    w = jax.random.uniform(
        kw, (IN_FEATURES, OUT_FEATURES), jnp.float32, -bound, bound
    )
    b = jax.random.uniform(kb, (OUT_FEATURES,), jnp.float32, -bound, bound)
    return w, b


if __name__ == "__main__":
    key = jax.random.PRNGKey(0)
    k_x, k_p = jax.random.split(key)

    B = 2
    x = jax.random.normal(k_x, (B, IN_FEATURES), jnp.float32)
    w, b = init_params(k_p)

    ref = x @ w + b

    # Exact-precision path (f32 MXU): matches the PyTorch module numerics tightly.
    out_f32 = jax.block_until_ready(
        classifier_net_forward(x, w, b, mxu_dtype=jnp.float32))
    assert out_f32.shape == (B, OUT_FEATURES)
    assert jnp.allclose(out_f32, ref, atol=1e-4, rtol=1e-4)

    # Default fast path: bf16 MXU inputs with f32 accumulation (perf review;
    # key on v5e). Tolerance loosened for bf16 input rounding over K=2048.
    out_fast = jax.block_until_ready(classifier_net_forward(x, w, b))
    assert out_fast.shape == (B, OUT_FEATURES)
    assert jnp.allclose(out_fast, ref, atol=2e-2, rtol=2e-2)

    print("KERNEL_OK")
</pallas_src>

<mosaic_0001>
module attributes {stable_mosaic.version = 11 : i64} {
  func.func @linear_kernel(%arg0: i32, %arg1: memref<8x2048xf32, #tpu.memory_space<vmem>>, %arg2: memref<2048x128xf32, #tpu.memory_space<vmem>>, %arg3: memref<1x128xf32, #tpu.memory_space<vmem>>, %arg4: memref<8x128xf32, #tpu.memory_space<vmem>>) attributes {dimension_semantics = [#tpu.dimension_semantics<parallel>], iteration_bounds = array<i64: 1>, scalar_prefetch = 0 : i64, scratch_operands = 0 : i64, tpu.core_type = #tpu.core_type<tc>, window_params = [{transform_indices = @transform_0, window_bounds = array<i64: 8, 2048>}, {pipeline_mode = #tpu.pipeline_mode<synchronous>, transform_indices = @transform_1, window_bounds = array<i64: 2048, 128>}, {pipeline_mode = #tpu.pipeline_mode<synchronous>, transform_indices = @transform_2, window_bounds = array<i64: 1, 128>}, {transform_indices = @transform_3, window_bounds = array<i64: 8, 128>}]} {
    %c0 = arith.constant 0 : index
    %c0_0 = arith.constant 0 : index
    %0 = vector.load %arg1[%c0, %c0_0] : memref<8x2048xf32, #tpu.memory_space<vmem>>, vector<8x2048xf32>
    %c0_1 = arith.constant 0 : index
    %c0_2 = arith.constant 0 : index
    %1 = vector.load %arg2[%c0_1, %c0_2] : memref<2048x128xf32, #tpu.memory_space<vmem>>, vector<2048x128xf32>
    %cst = arith.constant dense<0.000000e+00> : vector<8x128xf32>
    %2 = tpu.matmul %0, %1, %cst {dimension_numbers = #tpu.dot_dimension_numbers<[1], [0], [0], [1], [0, 0, 1, 1], [], []>} : vector<8x2048xf32>, vector<2048x128xf32>, vector<8x128xf32> -> vector<8x128xf32>
    %c0_3 = arith.constant 0 : index
    %c0_4 = arith.constant 0 : index
    %3 = vector.load %arg3[%c0_3, %c0_4] : memref<1x128xf32, #tpu.memory_space<vmem>>, vector<1x128xf32>
    %4 = vector.broadcast %3 : vector<1x128xf32> to vector<8x128xf32>
    %5 = arith.addf %2, %4 : vector<8x128xf32>
    %c0_5 = arith.constant 0 : index
    %c0_6 = arith.constant 0 : index
    %6 = vector.load %arg4[%c0_5, %c0_6] : memref<8x128xf32, #tpu.memory_space<vmem>>, vector<8x128xf32>
    tpu.vector_store %arg4[%c0_5, %c0_6], %5 {strides = array<i32>} : memref<8x128xf32, #tpu.memory_space<vmem>>, vector<8x128xf32>,
    return
  }
  func.func @transform_0(%arg0: i32) -> (i32, i32) {
    %c0_i32 = arith.constant 0 : i32
    %c0_i32_0 = arith.constant 0 : i32
    return %arg0, %c0_i32 : i32, i32
  }
  func.func @transform_1(%arg0: i32) -> (i32, i32) {
    %c0_i32 = arith.constant 0 : i32
    %c0_i32_0 = arith.constant 0 : i32
    %c0_i32_1 = arith.constant 0 : i32
    return %c0_i32, %c0_i32_0 : i32, i32
  }
  func.func @transform_2(%arg0: i32) -> (i32, i32) {
    %c0_i32 = arith.constant 0 : i32
    %c0_i32_0 = arith.constant 0 : i32
    %c0_i32_1 = arith.constant 0 : i32
    return %c0_i32, %c0_i32_0 : i32, i32
  }
  func.func @transform_3(%arg0: i32) -> (i32, i32) {
    %c0_i32 = arith.constant 0 : i32
    %c0_i32_0 = arith.constant 0 : i32
    return %arg0, %c0_i32 : i32, i32
  }
}

</mosaic_0001>

<bundles_post_ra>
// kernel: tpu_custom_call.1
= control target key start
LH: loop header
LB: loop body
LE: loop exit
PB: predicated region body
PF: predicated region fallthrough
CT: control target
= control target key end

     0   :  { %8 = vsyncpa [#allocation3], 0  ;;  %s1832_s0 = inlined_call_operand.hbm [shape: f32[2,2048], index: 0, kind: input, shape index: {}]   ;;  %s1833_s1 = inlined_call_operand.hbm [shape: f32[2048,128], index: 1, kind: input, shape index: {}]   ;;  %s1834_s2 = inlined_call_operand.vmem [shape: f32[1,128], index: 2, kind: input, shape index: {}]   ;;  %s1835_s3 = inlined_call_operand.hbm [shape: f32[2,128], index: 3, kind: output, shape index: {}]  }
   0x1   :  { %9 = vsyncpa [#allocation6], 0 }
   0x2   :  { %10 = vsyncpa [#allocation4], 0 }
   0x3   :  { %15 = vsyncadd [#allocation3], 1536  ;;  %s1695_s12 = smov [#allocation2]   ;;  %s1623_s16 = scalar_lea.hbm %s1832_s0, 512 }
   0x4   :  { %s16_s13 = sshll.u32 %s1695_s12, 4  ;;  %p1624_p0 = scmp.ne.s32.totalorder %s1832_s0, %s1623_s16  ;;  %s17_s13 = int_to_ptr.vmem [resolvable:$true] %s16_s13 }
   0x5   :  { %p1627_p1 = scmp.lt.u32.totalorder %s1623_s16, %s1832_s0 }
   0x7   :  { %p1629_p2 = pnand %p1627_p1, %p1624_p0 }
   0x9   :  { %1632 = shalt.err (!%p1629_p2)
}
   0xa   :  { %s1633_s21 = scalar_lea.vmem %s17_s13, 512  ;;  %s1637_s22 = scalar_lea.vmem %s17_s13, 2048 }
   0xb   :  { %p1634_p3 = scmp.ne.s32.totalorder %s17_s13, %s1633_s21  ;;  %p1638_p4 = scmp.lt.s32.totalorder %s17_s13, %s17_s13 }
   0xc   :  { %p1639_p5 = scmp.lt.s32.totalorder %s1637_s22, %s1633_s21 }
   0xe   :  { %p1640_p6 = por %p1639_p5, %p1638_p4 }
  0x10   :  { %p1641_p7 = pnand %p1640_p6, %p1634_p3 }
  0x12   :  { %1644 = shalt.err (!%p1641_p7)
}
  0x13   :  { %s1696_s23 = smov 512   ;;  %s1697_s24 = smov 32  }
  0x14   :  { %22 = dma.hbm_to_vmem [thread:$0]  %s1832_s0, 512, %s17_s13, [#allocation3], %s1696_s23, %s1696_s23, %s1697_s24  }
  0x15   :  { %s1698_s27 = smov [#allocation5]   ;;  %s1645_s4 = scalar_lea.hbm %s1833_s1, 32768 }
  0x16   :  { %s28_s28 = sshll.u32 %s1698_s27, 4  ;;  %p1646_p8 = scmp.ne.s32.totalorder %s1833_s1, %s1645_s4  ;;  %s29_s28 = int_to_ptr.vmem [resolvable:$true] %s28_s28 }
  0x17   :  { %p1649_p9 = scmp.lt.u32.totalorder %s1645_s4, %s1833_s1 }
  0x19   :  { %p1651_p10 = pnand %p1649_p9, %p1646_p8 }
  0x1b   :  { %1654 = shalt.err (!%p1651_p10)
}
  0x1c   :  { %s1655_s9 = scalar_lea.vmem %s29_s28, 32768  ;;  %p1660_p12 = scmp.lt.s32.totalorder %s29_s28, %s29_s28 }
  0x1d   :  { %p1656_p11 = scmp.ne.s32.totalorder %s29_s28, %s1655_s9  ;;  %p1661_p13 = scmp.lt.s32.totalorder %s1655_s9, %s1655_s9 }
  0x1f   :  { %p1662_p0 = por %p1661_p13, %p1660_p12 }
  0x21   :  { %p1663_p1 = pnand %p1662_p0, %p1656_p11 }
  0x23   :  { %1666 = shalt.err (!%p1663_p1)
}
  0x24   :  { %s1699_s0 = smov 128   ;;  %s1700_s10 = smov 8  }
  0x25   :  { %34 = dma.hbm_to_vmem [thread:$0]  %s1833_s1, 32768, %s29_s28, [#allocation6], %s1699_s0, %s1699_s0, %s1700_s10  }
  0x26   :  { %1689 = dma.done.wait [#allocation3], 2048  }
  0x27   :  { %1690 = vsyncadd [#allocation3], 4294965248 }
  0x28   :  { %1691 = dma.done.wait [#allocation6], 32768  }
  0x29   :  { %1692 = vsyncadd [#allocation6], 4294934528  ;;  %v75_v0 = vld [vmem:[#allocation5 + $0x80] sm:$0xff]  ;;  %v76_v1 = vld [vmem:[#allocation5 + $0x88] sm:$0xff]  ;;  %v1701_v51 = vmov 1983009808   ;;  %v345_v53 = vlaneseq }
  0x2a   :  { %v59_v2 = vld [vmem:[#allocation5] sm:$0xff]  ;;  %v1358_v3 = vpack.c.bf16 %v76_v1, %v75_v0  ;;  %v60_v4 = vld [vmem:[#allocation5 + $0x8] sm:$0xff]  ;;  %v77_v11 = vld [vmem:[#allocation5 + $0x90] sm:$0xff]  ;;  %v343_v52 = vunpack.c.l.s4 %v1701_v51 }
  0x2b   :  { %v107_v5 = vld [vmem:[#allocation5 + $0x180] sm:$0xff]  ;;  %v108_v6 = vld [vmem:[#allocation5 + $0x188] sm:$0xff]  ;;  %v1360_v7 = vpack.c.bf16 %v60_v4, %v59_v2  ;;  %v78_v13 = vld [vmem:[#allocation5 + $0x98] sm:$0xff] }
  0x2c   :  { %v1390_v8 = vpack.c.bf16 %v108_v6, %v107_v5  ;;  %v91_v9 = vld [vmem:[#allocation5 + $0x100] sm:$0xff]  ;;  %v92_v10 = vld [vmem:[#allocation5 + $0x108] sm:$0xff]  ;;  %1359 = vmatprep.subr.bf16.mxu0 %v1358_v3  ;;  %v61_v14 = vld [vmem:[#allocation5 + $0x10] sm:$0xff]  ;;  %v1362_v16 = vpack.c.bf16 %v78_v13, %v77_v11  ;;  %v344_v2 = vunpack.c.0.s8 %v343_v52  ;;  %v346_v3 = vshrl.u32 %v345_v53, 7 }
  0x2d   :  { %v1392_v12 = vpack.c.bf16 %v92_v10, %v91_v9  ;;  %v62_v15 = vld [vmem:[#allocation5 + $0x18] sm:$0xff]  ;;  %1361 = vmatpush3.bf16.msra.mxu0 %v1360_v7  ;;  %v109_v18 = vld [vmem:[#allocation5 + $0x190] sm:$0xff]  ;;  %v79_v23 = vld [vmem:[#allocation5 + $0xa0] sm:$0xff] }
  0x2e   :  { %1391 = vmatprep.subr.bf16.mxu1 %v1390_v8  ;;  %v1364_v17 = vpack.c.bf16 %v62_v15, %v61_v14  ;;  %v110_v19 = vld [vmem:[#allocation5 + $0x198] sm:$0xff]  ;;  %v93_v20 = vld [vmem:[#allocation5 + $0x110] sm:$0xff]  ;;  %v80_v24 = vld [vmem:[#allocation5 + $0xa8] sm:$0xff]  ;;  %1363 = vmatprep.subr.bf16.mxu0 %v1362_v16 }
  0x2f   :  { %1393 = vmatpush3.bf16.msra.mxu1 %v1392_v12  ;;  %v1394_v21 = vpack.c.bf16 %v110_v19, %v109_v18  ;;  %v94_v22 = vld [vmem:[#allocation5 + $0x118] sm:$0xff]  ;;  %v1366_v26 = vpack.c.bf16 %v80_v24, %v79_v23  ;;  %v63_v27 = vld [vmem:[#allocation5 + $0x20] sm:$0xff]  ;;  %v64_v28 = vld [vmem:[#allocation5 + $0x28] sm:$0xff] }
  0x30   :  { %v1396_v25 = vpack.c.bf16 %v94_v22, %v93_v20  ;;  %v111_v29 = vld [vmem:[#allocation5 + $0x1a0] sm:$0xff]  ;;  %v112_v30 = vld [vmem:[#allocation5 + $0x1a8] sm:$0xff]  ;;  %v1368_v33 = vpack.c.bf16 %v64_v28, %v63_v27  ;;  %v81_v35 = vld [vmem:[#allocation5 + $0xb0] sm:$0xff]  ;;  %v1749_v20 = vsub.s32 %v344_v2, %v346_v3 }
  0x31   :  { %1395 = vmatprep.subr.bf16.mxu1 %v1394_v21  ;;  %v95_v31 = vld [vmem:[#allocation5 + $0x120] sm:$0xff]  ;;  %v96_v32 = vld [vmem:[#allocation5 + $0x128] sm:$0xff]  ;;  %1365 = vmatpush3.bf16.msra.mxu0 %v1364_v17  ;;  %v1398_v34 = vpack.c.bf16 %v112_v30, %v111_v29  ;;  %v82_v36 = vld [vmem:[#allocation5 + $0xb8] sm:$0xff] }
  0x32   :  { %v65_v37 = vld [vmem:[#allocation5 + $0x30] sm:$0xff]  ;;  %1367 = vmatprep.subr.bf16.mxu0 %v1366_v26  ;;  %v1400_v38 = vpack.c.bf16 %v96_v32, %v95_v31  ;;  %v1370_v39 = vpack.c.bf16 %v82_v36, %v81_v35  ;;  %v66_v40 = vld [vmem:[#allocation5 + $0x38] sm:$0xff]  ;;  %v83_v46 = vld [vmem:[#allocation5 + $0xc0] sm:$0xff] }
  0x33   :  { %1397 = vmatpush3.bf16.msra.mxu1 %v1396_v25  ;;  %v113_v41 = vld [vmem:[#allocation5 + $0x1b0] sm:$0xff]  ;;  %v114_v42 = vld [vmem:[#allocation5 + $0x1b8] sm:$0xff]  ;;  %v84_v47 = vld [vmem:[#allocation5 + $0xc8] sm:$0xff]  ;;  %v1372_v48 = vpack.c.bf16 %v66_v40, %v65_v37 }
  0x34   :  { %1399 = vmatprep.subr.bf16.mxu1 %v1398_v34  ;;  %v1402_v43 = vpack.c.bf16 %v114_v42, %v113_v41  ;;  %v97_v44 = vld [vmem:[#allocation5 + $0x130] sm:$0xff]  ;;  %v98_v45 = vld [vmem:[#allocation5 + $0x138] sm:$0xff]  ;;  %v115_v49 = vld [vmem:[#allocation5 + $0x1c0] sm:$0xff]  ;;  %v1374_v55 = vpack.c.bf16 %v84_v47, %v83_v46 }
  0x35   :  { %1369 = vmatpush3.bf16.msra.mxu0 %v1368_v33  ;;  %v116_v50 = vld [vmem:[#allocation5 + $0x1c8] sm:$0xff]  ;;  %v1404_v54 = vpack.c.bf16 %v98_v45, %v97_v44  ;;  %v67_v56 = vld [vmem:[#allocation5 + $0x40] sm:$0xff]  ;;  %v85_v61 = vld [vmem:[#allocation5 + $0xd0] sm:$0xff] }
  0x36   :  { %1371 = vmatprep.subr.bf16.mxu0 %v1370_v39  ;;  %v68_v57 = vld [vmem:[#allocation5 + $0x48] sm:$0xff]  ;;  %v99_v58 = vld [vmem:[#allocation5 + $0x140] sm:$0xff]  ;;  %v1406_v59 = vpack.c.bf16 %v116_v50, %v115_v49  ;;  %v86_v62 = vld [vmem:[#allocation5 + $0xd8] sm:$0xff] }
  0x37   :  { %1401 = vmatpush3.bf16.msra.mxu1 %v1400_v38  ;;  %v100_v60 = vld [vmem:[#allocation5 + $0x148] sm:$0xff]  ;;  %v117_v63 = vld [vmem:[#allocation5 + $0x1d0] sm:$0xff]  ;;  %v118_v0 = vld [vmem:[#allocation5 + $0x1d8] sm:$0xff]  ;;  %v1376_v1 = vpack.c.bf16 %v68_v57, %v67_v56  ;;  %v1378_v5 = vpack.c.bf16 %v86_v62, %v85_v61 }
  0x38   :  { %1403 = vmatprep.subr.bf16.mxu1 %v1402_v43  ;;  %v1408_v4 = vpack.c.bf16 %v100_v60, %v99_v58  ;;  %v69_v6 = vld [vmem:[#allocation5 + $0x50] sm:$0xff]  ;;  %v70_v7 = vld [vmem:[#allocation5 + $0x58] sm:$0xff]  ;;  %v1410_v9 = vpack.c.bf16 %v118_v0, %v117_v63  ;;  %v87_v11 = vld [vmem:[#allocation5 + $0xe0] sm:$0xff] }
  0x39   :  { %1373 = vmatpush3.bf16.msra.mxu0 %v1372_v48  ;;  %v101_v8 = vld [vmem:[#allocation5 + $0x150] sm:$0xff]  ;;  %v102_v10 = vld [vmem:[#allocation5 + $0x158] sm:$0xff]  ;;  %v88_v12 = vld [vmem:[#allocation5 + $0xe8] sm:$0xff]  ;;  %v1380_v16 = vpack.c.bf16 %v70_v7, %v69_v6 }
  0x3a   :  { %1375 = vmatprep.subr.bf16.mxu0 %v1374_v55  ;;  %v71_v13 = vld [vmem:[#allocation5 + $0x60] sm:$0xff]  ;;  %v120_v15 = vld [vmem:[#allocation5 + $0x1e8] sm:$0xff]  ;;  %v1412_v21 = vpack.c.bf16 %v102_v10, %v101_v8  ;;  %v1382_v22 = vpack.c.bf16 %v88_v12, %v87_v11  ;;  %v89_v23 = vld [vmem:[#allocation5 + $0xf0] sm:$0xff] }
  0x3b   :  { %1405 = vmatpush3.bf16.msra.mxu1 %v1404_v54  ;;  %v119_v14 = vld [vmem:[#allocation5 + $0x1e0] sm:$0xff]  ;;  %v72_v17 = vld [vmem:[#allocation5 + $0x68] sm:$0xff]  ;;  %v90_v27 = vld [vmem:[#allocation5 + $0xf8] sm:$0xff] }
  0x3c   :  { %1407 = vmatprep.subr.bf16.mxu1 %v1406_v59  ;;  %v103_v18 = vld [vmem:[#allocation5 + $0x160] sm:$0xff]  ;;  %v104_v19 = vld [vmem:[#allocation5 + $0x168] sm:$0xff]  ;;  %v1414_v26 = vpack.c.bf16 %v120_v15, %v119_v14  ;;  %v121_v32 = vld [vmem:[#allocation5 + $0x1f0] sm:$0xff]  ;;  %v1384_v36 = vpack.c.bf16 %v72_v17, %v71_v13  ;;  %v1386_v40 = vpack.c.bf16 %v90_v27, %v89_v23 }
  0x3d   :  { %1377 = vmatpush3.bf16.msra.mxu0 %v1376_v1  ;;  %v43_v24 = vld [vmem:[#allocation2] sm:$0xff]  ;;  %v122_v33 = vld [vmem:[#allocation5 + $0x1f8] sm:$0xff]  ;;  %v1416_v37 = vpack.c.bf16 %v104_v19, %v103_v18  ;;  %v73_v41 = vld [vmem:[#allocation5 + $0x70] sm:$0xff] }
  0x3e   :  { %1379 = vmatprep.subr.bf16.mxu0 %v1378_v5  ;;  %v47_v25 = vld [vmem:[#allocation2 + $0x20] sm:$0xff]  ;;  %v74_v42 = vld [vmem:[#allocation5 + $0x78] sm:$0xff]  ;;  %v105_v43 = vld [vmem:[#allocation5 + $0x170] sm:$0xff]  ;;  %v1418_v46 = vpack.c.bf16 %v122_v33, %v121_v32 }
  0x3f   :  { %1409 = vmatpush3.bf16.msra.mxu1 %v1408_v4  ;;  %v51_v28 = vld [vmem:[#allocation2 + $0x40] sm:$0xff]  ;;  %v338_v30 = vcombine.low %v43_v24, %v47_v25  ;;  %v339_v31 = vcombine.high %v43_v24, %v47_v25  ;;  %v106_v47 = vld [vmem:[#allocation5 + $0x178] sm:$0xff]  ;;  %v140_v49 = vld [vmem:[#allocation5 + $0x288] sm:$0xff]  ;;  %v1388_v54 = vpack.c.bf16 %v74_v42, %v73_v41 }
  0x40   :  { %1411 = vmatprep.subr.bf16.mxu1 %v1410_v9  ;;  %v55_v29 = vld [vmem:[#allocation2 + $0x60] sm:$0xff]  ;;  %v172_v53 = vld [vmem:[#allocation5 + $0x388] sm:$0xff]  ;;  %v1420_v55 = vpack.c.bf16 %v106_v47, %v105_v43  ;;  %v141_v62 = vld [vmem:[#allocation5 + $0x290] sm:$0xff] }
  0x41   :  { %v340_v34 = vcombine.low %v51_v28, %v55_v29  ;;  %v341_v35 = vcombine.high %v51_v28, %v55_v29  ;;  %1381 = vmatpush3.bf16.msra.mxu0 %v1380_v16  ;;  %v348_v38 = vrot.slane %v338_v30, %v1749_v20  ;;  %v355_v39 = vrot.slane %v339_v31, %v1749_v20  ;;  %v139_v48 = vld [vmem:[#allocation5 + $0x280] sm:$0xff]  ;;  %v124_v58 = vld [vmem:[#allocation5 + $0x208] sm:$0xff]  ;;  %v142_v63 = vld [vmem:[#allocation5 + $0x298] sm:$0xff] }
  0x42   :  { %1383 = vmatprep.subr.bf16.mxu0 %v1382_v22  ;;  %v171_v52 = vld [vmem:[#allocation5 + $0x380] sm:$0xff]  ;;  %v1422_v56 = vpack.c.bf16 %v140_v49, %v139_v48  ;;  %v156_v61 = vld [vmem:[#allocation5 + $0x308] sm:$0xff]  ;;  %v173_v1 = vld [vmem:[#allocation5 + $0x390] sm:$0xff]  ;;  %v1426_v6 = vpack.c.bf16 %v142_v63, %v141_v62 }
  0x43   :  { %1413 = vmatpush3.bf16.msra.mxu1 %v1412_v21  ;;  %v362_v44 = vrot.slane %v340_v34, %v1749_v20  ;;  %v369_v45 = vrot.slane %v341_v35, %v1749_v20  ;;  %v123_v57 = vld [vmem:[#allocation5 + $0x200] sm:$0xff]  ;;  %v1454_v60 = vpack.c.bf16 %v172_v53, %v171_v52  ;;  %v174_v2 = vld [vmem:[#allocation5 + $0x398] sm:$0xff]  ;;  %v125_v7 = vld [vmem:[#allocation5 + $0x210] sm:$0xff] }
  0x44   :  { %1415 = vmatprep.subr.bf16.mxu1 %v1414_v26  ;;  %v155_v59 = vld [vmem:[#allocation5 + $0x300] sm:$0xff]  ;;  %v1424_v3 = vpack.c.bf16 %v124_v58, %v123_v57  ;;  %v126_v8 = vld [vmem:[#allocation5 + $0x218] sm:$0xff]  ;;  %v157_v9 = vld [vmem:[#allocation5 + $0x310] sm:$0xff]  ;;  %v1458_v10 = vpack.c.bf16 %v174_v2, %v173_v1 }
  0x45   :  { %v371_v50 = vcombine.high %v348_v38, %v362_v44  ;;  %v373_v51 = vcombine.high %v355_v39, %v369_v45  ;;  %1385 = vmatpush3.bf16.msra.mxu0 %v1384_v36  ;;  %v370_v0 = vcombine.low %v348_v38, %v362_v44  ;;  %v372_v4 = vcombine.low %v355_v39, %v369_v45  ;;  %v158_v11 = vld [vmem:[#allocation5 + $0x318] sm:$0xff]  ;;  %v143_v12 = vld [vmem:[#allocation5 + $0x2a0] sm:$0xff]  ;;  %v144_v13 = vld [vmem:[#allocation5 + $0x2a8] sm:$0xff] }
  0x46   :  { %1387 = vmatprep.subr.bf16.mxu0 %v1386_v40  ;;  %v1456_v5 = vpack.c.bf16 %v156_v61, %v155_v59  ;;  %v175_v14 = vld [vmem:[#allocation5 + $0x3a0] sm:$0xff]  ;;  %v176_v15 = vld [vmem:[#allocation5 + $0x3a8] sm:$0xff]  ;;  %v1428_v16 = vpack.c.bf16 %v126_v8, %v125_v7  ;;  %v1460_v17 = vpack.c.bf16 %v158_v11, %v157_v9  ;;  %v1430_v18 = vpack.c.bf16 %v144_v13, %v143_v12  ;;  %v145_v25 = vld [vmem:[#allocation5 + $0x2b0] sm:$0xff] }
  0x47   :  { %1417 = vmatpush3.bf16.msra.mxu1 %v1416_v37  ;;  %562 = vmatprep.mubr.f32.mxu0 %v371_v50  ;;  %v127_v19 = vld [vmem:[#allocation5 + $0x220] sm:$0xff]  ;;  %v128_v21 = vld [vmem:[#allocation5 + $0x228] sm:$0xff]  ;;  %v1462_v23 = vpack.c.bf16 %v176_v15, %v175_v14  ;;  %v146_v26 = vld [vmem:[#allocation5 + $0x2b8] sm:$0xff] }
  0x48   :  { %1419 = vmatprep.subr.bf16.mxu1 %v1418_v46  ;;  %632 = vmatprep.mubr.f32.mxu1 %v373_v51  ;;  %v159_v22 = vld [vmem:[#allocation5 + $0x320] sm:$0xff]  ;;  %v160_v24 = vld [vmem:[#allocation5 + $0x328] sm:$0xff]  ;;  %v177_v27 = vld [vmem:[#allocation5 + $0x3b0] sm:$0xff]  ;;  %v1432_v29 = vpack.c.bf16 %v128_v21, %v127_v19  ;;  %v1434_v32 = vpack.c.bf16 %v146_v26, %v145_v25 }
  0x49   :  { %1389 = vmatpush3.bf16.msra.mxu0 %v1388_v54  ;;  %v178_v28 = vld [vmem:[#allocation5 + $0x3b8] sm:$0xff]  ;;  %v129_v30 = vld [vmem:[#allocation5 + $0x230] sm:$0xff]  ;;  %v1464_v31 = vpack.c.bf16 %v160_v24, %v159_v22  ;;  %v147_v37 = vld [vmem:[#allocation5 + $0x2c0] sm:$0xff] }
  0x4a   :  { %1423 = vmatprep.subr.bf16.mxu0 %v1422_v56  ;;  %v130_v33 = vld [vmem:[#allocation5 + $0x238] sm:$0xff]  ;;  %v161_v34 = vld [vmem:[#allocation5 + $0x330] sm:$0xff]  ;;  %v1466_v36 = vpack.c.bf16 %v178_v28, %v177_v27  ;;  %v148_v38 = vld [vmem:[#allocation5 + $0x2c8] sm:$0xff] }
  0x4b   :  { %1421 = vmatpush3.bf16.msra.mxu1 %v1420_v55  ;;  %v162_v35 = vld [vmem:[#allocation5 + $0x338] sm:$0xff]  ;;  %v131_v39 = vld [vmem:[#allocation5 + $0x240] sm:$0xff]  ;;  %v180_v41 = vld [vmem:[#allocation5 + $0x3c8] sm:$0xff]  ;;  %v1436_v42 = vpack.c.bf16 %v130_v33, %v129_v30  ;;  %v1438_v47 = vpack.c.bf16 %v148_v38, %v147_v37 }
  0x4c   :  { %1455 = vmatprep.subr.bf16.mxu1 %v1454_v60  ;;  %563 = vmatmul.mubr.f32.vlgmr.msra.gmra.mrb[0].mxu0 %v370_v0  ;;  %v179_v40 = vld [vmem:[#allocation5 + $0x3c0] sm:$0xff]  ;;  %v1468_v43 = vpack.c.bf16 %v162_v35, %v161_v34  ;;  %v44_v44 = vld [vmem:[#allocation2 + $0x8] sm:$0xff]  ;;  %v149_v55 = vld [vmem:[#allocation5 + $0x2d0] sm:$0xff] }
  0x4d   :  { %1425 = vmatpush3.bf16.msra.mxu0 %v1424_v3  ;;  %v48_v45 = vld [vmem:[#allocation2 + $0x28] sm:$0xff]  ;;  %v163_v49 = vld [vmem:[#allocation5 + $0x340] sm:$0xff]  ;;  %v1470_v53 = vpack.c.bf16 %v180_v41, %v179_v40  ;;  %v150_v56 = vld [vmem:[#allocation5 + $0x2d8] sm:$0xff] }
  0x4e   :  { %633 = vmatmul.mubr.f32.vlgmr.msra.gmra.mrb[0].mxu1 %v372_v4  ;;  %1427 = vmatprep.subr.bf16.mxu0 %v1426_v6  ;;  %v52_v46 = vld [vmem:[#allocation2 + $0x48] sm:$0xff]  ;;  %v374_v51 = vcombine.low %v44_v44, %v48_v45  ;;  %v375_v52 = vcombine.high %v44_v44, %v48_v45  ;;  %v181_v59 = vld [vmem:[#allocation5 + $0x3d0] sm:$0xff]  ;;  %v182_v60 = vld [vmem:[#allocation5 + $0x3d8] sm:$0xff]  ;;  %v1442_v3 = vpack.c.bf16 %v150_v56, %v149_v55 }
  0x4f   :  { %1457 = vmatpush3.bf16.msra.mxu1 %v1456_v5  ;;  %v132_v48 = vld [vmem:[#allocation5 + $0x248] sm:$0xff]  ;;  %v133_v4 = vld [vmem:[#allocation5 + $0x250] sm:$0xff]  ;;  %v134_v5 = vld [vmem:[#allocation5 + $0x258] sm:$0xff]  ;;  %v1474_v7 = vpack.c.bf16 %v182_v60, %v181_v59 }
  0x50   :  { %1459 = vmatprep.subr.bf16.mxu1 %v1458_v10  ;;  %v56_v50 = vld [vmem:[#allocation2 + $0x68] sm:$0xff]  ;;  %v1756_v61 = vrot.slane %v374_v51, %v1749_v20  ;;  %v1759_v62 = vrot.slane %v375_v52, %v1749_v20  ;;  %v1440_v63 = vpack.c.bf16 %v132_v48, %v131_v39  ;;  %v165_v6 = vld [vmem:[#allocation5 + $0x350] sm:$0xff]  ;;  %v166_v8 = vld [vmem:[#allocation5 + $0x358] sm:$0xff]  ;;  %v1444_v15 = vpack.c.bf16 %v134_v5, %v133_v4 }
  0x51   :  { %1429 = vmatpush3.bf16.msra.mxu0 %v1428_v16  ;;  %v164_v54 = vld [vmem:[#allocation5 + $0x348] sm:$0xff]  ;;  %v376_v57 = vcombine.low %v52_v46, %v56_v50  ;;  %v377_v58 = vcombine.high %v52_v46, %v56_v50  ;;  %v151_v9 = vld [vmem:[#allocation5 + $0x2e0] sm:$0xff]  ;;  %v1476_v16 = vpack.c.bf16 %v166_v8, %v165_v6  ;;  %v153_v24 = vld [vmem:[#allocation5 + $0x2f0] sm:$0xff] }
  0x52   :  { %1431 = vmatprep.subr.bf16.mxu0 %v1430_v18  ;;  %v1472_v2 = vpack.c.bf16 %v164_v54, %v163_v49  ;;  %v152_v10 = vld [vmem:[#allocation5 + $0x2e8] sm:$0xff]  ;;  %v183_v13 = vld [vmem:[#allocation5 + $0x3e0] sm:$0xff]  ;;  %v154_v25 = vld [vmem:[#allocation5 + $0x2f8] sm:$0xff] }
  0x53   :  { %1461 = vmatpush3.bf16.msra.mxu1 %v1460_v17  ;;  %v1762_v0 = vrot.slane %v376_v57, %v1749_v20  ;;  %v1765_v1 = vrot.slane %v377_v58, %v1749_v20  ;;  %v184_v14 = vld [vmem:[#allocation5 + $0x3e8] sm:$0xff]  ;;  %v1446_v17 = vpack.c.bf16 %v152_v10, %v151_v9  ;;  %v135_v18 = vld [vmem:[#allocation5 + $0x260] sm:$0xff]  ;;  %v185_v26 = vld [vmem:[#allocation5 + $0x3f0] sm:$0xff]  ;;  %v1450_v30 = vpack.c.bf16 %v154_v25, %v153_v24 }
  0x54   :  { %1463 = vmatprep.subr.bf16.mxu1 %v1462_v23  ;;  %v136_v19 = vld [vmem:[#allocation5 + $0x268] sm:$0xff]  ;;  %v167_v21 = vld [vmem:[#allocation5 + $0x360] sm:$0xff]  ;;  %v1478_v22 = vpack.c.bf16 %v184_v14, %v183_v13  ;;  %v186_v27 = vld [vmem:[#allocation5 + $0x3f8] sm:$0xff] }
  0x55   :  { %1433 = vmatpush3.bf16.msra.mxu0 %v1432_v29  ;;  %v407_v11 = vcombine.high %v1756_v61, %v1762_v0  ;;  %v409_v12 = vcombine.high %v1759_v62, %v1765_v1  ;;  %v168_v23 = vld [vmem:[#allocation5 + $0x368] sm:$0xff]  ;;  %v1448_v28 = vpack.c.bf16 %v136_v19, %v135_v18  ;;  %v169_v33 = vld [vmem:[#allocation5 + $0x370] sm:$0xff]  ;;  %v1482_v34 = vpack.c.bf16 %v186_v27, %v185_v26  ;;  %v170_v35 = vld [vmem:[#allocation5 + $0x378] sm:$0xff] }
  0x56   :  { %1435 = vmatprep.subr.bf16.mxu0 %v1434_v32  ;;  %v1480_v29 = vpack.c.bf16 %v168_v23, %v167_v21  ;;  %v138_v32 = vld [vmem:[#allocation5 + $0x278] sm:$0xff]  ;;  %v204_v37 = vld [vmem:[#allocation5 + $0x488] sm:$0xff]  ;;  %v235_v38 = vld [vmem:[#allocation5 + $0x580] sm:$0xff]  ;;  %v1484_v41 = vpack.c.bf16 %v170_v35, %v169_v33  ;;  %v406_v50 = vcombine.low %v1756_v61, %v1762_v0  ;;  %v408_v54 = vcombine.low %v1759_v62, %v1765_v1 }
  0x57   :  { %1465 = vmatpush3.bf16.msra.mxu1 %v1464_v31  ;;  %702 = vmatprep.mubr.f32.mxu0 %v407_v11  ;;  %v137_v31 = vld [vmem:[#allocation5 + $0x270] sm:$0xff]  ;;  %v236_v39 = vld [vmem:[#allocation5 + $0x588] sm:$0xff]  ;;  %v219_v45 = vld [vmem:[#allocation5 + $0x500] sm:$0xff] }
  0x58   :  { %1467 = vmatprep.subr.bf16.mxu1 %v1466_v36  ;;  %772 = vmatprep.mubr.f32.mxu1 %v409_v12  ;;  %v203_v36 = vld [vmem:[#allocation5 + $0x480] sm:$0xff]  ;;  %v1452_v40 = vpack.c.bf16 %v138_v32, %v137_v31  ;;  %v188_v44 = vld [vmem:[#allocation5 + $0x408] sm:$0xff]  ;;  %v1518_v46 = vpack.c.bf16 %v236_v39, %v235_v38  ;;  %v205_v48 = vld [vmem:[#allocation5 + $0x490] sm:$0xff] }
  0x59   :  { %1437 = vmatpush3.bf16.msra.mxu0 %v1436_v42  ;;  %v1486_v42 = vpack.c.bf16 %v204_v37, %v203_v36  ;;  %v206_v49 = vld [vmem:[#allocation5 + $0x498] sm:$0xff]  ;;  %v237_v51 = vld [vmem:[#allocation5 + $0x590] sm:$0xff]  ;;  %v239_v61 = vld [vmem:[#allocation5 + $0x5a0] sm:$0xff] }
  0x5a   :  { %1439 = vmatprep.subr.bf16.mxu0 %v1438_v47  ;;  %v220_v47 = vld [vmem:[#allocation5 + $0x508] sm:$0xff]  ;;  %v238_v52 = vld [vmem:[#allocation5 + $0x598] sm:$0xff]  ;;  %v189_v55 = vld [vmem:[#allocation5 + $0x410] sm:$0xff]  ;;  %v1490_v59 = vpack.c.bf16 %v206_v49, %v205_v48 }
  0x5b   :  { %1469 = vmatpush3.bf16.msra.mxu1 %v1468_v43  ;;  %v187_v43 = vld [vmem:[#allocation5 + $0x400] sm:$0xff]  ;;  %v190_v56 = vld [vmem:[#allocation5 + $0x418] sm:$0xff]  ;;  %v221_v57 = vld [vmem:[#allocation5 + $0x510] sm:$0xff]  ;;  %v1520_v58 = vpack.c.bf16 %v220_v47, %v219_v45 }
  0x5c   :  { %1471 = vmatprep.subr.bf16.mxu1 %v1470_v53  ;;  %v1488_v53 = vpack.c.bf16 %v188_v44, %v187_v43  ;;  %v222_v60 = vld [vmem:[#allocation5 + $0x518] sm:$0xff]  ;;  %v240_v0 = vld [vmem:[#allocation5 + $0x5a8] sm:$0xff]  ;;  %v45_v4 = vld [vmem:[#allocation2 + $0x10] sm:$0xff]  ;;  %v1492_v5 = vpack.c.bf16 %v190_v56, %v189_v55 }
  0x5d   :  { %1441 = vmatpush3.bf16.msra.mxu0 %v1440_v63  ;;  %v207_v63 = vld [vmem:[#allocation5 + $0x4a0] sm:$0xff]  ;;  %v49_v6 = vld [vmem:[#allocation2 + $0x30] sm:$0xff]  ;;  %v1524_v10 = vpack.c.bf16 %v222_v60, %v221_v57  ;;  %v192_v13 = vld [vmem:[#allocation5 + $0x428] sm:$0xff] }
  0x5e   :  { %1443 = vmatprep.subr.bf16.mxu0 %v1442_v3  ;;  %v1522_v3 = vpack.c.bf16 %v238_v52, %v237_v51  ;;  %v57_v62 = vld [vmem:[#allocation2 + $0x70] sm:$0xff]  ;;  %v410_v1 = vcombine.low %v45_v4, %v49_v6  ;;  %v411_v9 = vcombine.high %v45_v4, %v49_v6  ;;  %v191_v12 = vld [vmem:[#allocation5 + $0x420] sm:$0xff]  ;;  %v210_v19 = vld [vmem:[#allocation5 + $0x4b8] sm:$0xff] }
  0x5f   :  { %1473 = vmatpush3.bf16.msra.mxu1 %v1472_v2  ;;  %v208_v2 = vld [vmem:[#allocation5 + $0x4a8] sm:$0xff]  ;;  %v223_v14 = vld [vmem:[#allocation5 + $0x520] sm:$0xff]  ;;  %v209_v18 = vld [vmem:[#allocation5 + $0x4b0] sm:$0xff]  ;;  %v1496_v27 = vpack.c.bf16 %v192_v13, %v191_v12 }
  0x60   :  { %1475 = vmatprep.subr.bf16.mxu1 %v1474_v7  ;;  %v53_v7 = vld [vmem:[#allocation2 + $0x50] sm:$0xff]  ;;  %v1494_v11 = vpack.c.bf16 %v208_v2, %v207_v63  ;;  %v1776_v21 = vrot.slane %v410_v1, %v1749_v20  ;;  %v1782_v23 = vrot.slane %v411_v9, %v1749_v20  ;;  %v242_v25 = vld [vmem:[#allocation5 + $0x5b8] sm:$0xff]  ;;  %v211_v37 = vld [vmem:[#allocation5 + $0x4c0] sm:$0xff] }
  0x61   :  { %1445 = vmatpush3.bf16.msra.mxu0 %v1444_v15  ;;  %v412_v8 = vcombine.low %v53_v7, %v57_v62  ;;  %v413_v15 = vcombine.high %v53_v7, %v57_v62  ;;  %v241_v24 = vld [vmem:[#allocation5 + $0x5b0] sm:$0xff]  ;;  %v194_v32 = vld [vmem:[#allocation5 + $0x438] sm:$0xff]  ;;  %v212_v38 = vld [vmem:[#allocation5 + $0x4c8] sm:$0xff] }
  0x62   :  { %1447 = vmatprep.subr.bf16.mxu0 %v1446_v17  ;;  %v224_v17 = vld [vmem:[#allocation5 + $0x528] sm:$0xff]  ;;  %v193_v31 = vld [vmem:[#allocation5 + $0x430] sm:$0xff]  ;;  %v1530_v35 = vpack.c.bf16 %v242_v25, %v241_v24  ;;  %v226_v36 = vld [vmem:[#allocation5 + $0x538] sm:$0xff]  ;;  %v1502_v43 = vpack.c.bf16 %v212_v38, %v211_v37 }
  0x63   :  { %1477 = vmatpush3.bf16.msra.mxu1 %v1476_v16  ;;  %v1526_v16 = vpack.c.bf16 %v240_v0, %v239_v61  ;;  %v1785_v26 = vrot.slane %v413_v15, %v1749_v20  ;;  %v225_v33 = vld [vmem:[#allocation5 + $0x530] sm:$0xff]  ;;  %v243_v39 = vld [vmem:[#allocation5 + $0x5c0] sm:$0xff]  ;;  %v196_v45 = vld [vmem:[#allocation5 + $0x448] sm:$0xff] }
  0x64   :  { %1479 = vmatprep.subr.bf16.mxu1 %v1478_v22  ;;  %v1779_v22 = vrot.slane %v412_v8, %v1749_v20  ;;  %v195_v44 = vld [vmem:[#allocation5 + $0x440] sm:$0xff]  ;;  %v228_v48 = vld [vmem:[#allocation5 + $0x548] sm:$0xff]  ;;  %v213_v49 = vld [vmem:[#allocation5 + $0x4d0] sm:$0xff] }
  0x65   :  { %1449 = vmatpush3.bf16.msra.mxu0 %v1448_v28  ;;  %v245_v51 = vld [vmem:[#allocation5 + $0x5d0] sm:$0xff]  ;;  %v246_v52 = vld [vmem:[#allocation5 + $0x5d8] sm:$0xff]  ;;  %v215_v63 = vld [vmem:[#allocation5 + $0x4e0] sm:$0xff] }
  0x66   :  { %1451 = vmatprep.subr.bf16.mxu0 %v1450_v30  ;;  %v443_v28 = vcombine.high %v1776_v21, %v1779_v22  ;;  %v1498_v30 = vpack.c.bf16 %v210_v19, %v209_v18  ;;  %v197_v56 = vld [vmem:[#allocation5 + $0x450] sm:$0xff]  ;;  %v198_v57 = vld [vmem:[#allocation5 + $0x458] sm:$0xff]  ;;  %v216_v2 = vld [vmem:[#allocation5 + $0x4e8] sm:$0xff] }
  0x67   :  { %1481 = vmatpush3.bf16.msra.mxu1 %v1480_v29  ;;  %v1528_v29 = vpack.c.bf16 %v224_v17, %v223_v14  ;;  %v230_v60 = vld [vmem:[#allocation5 + $0x558] sm:$0xff]  ;;  %v248_v61 = vld [vmem:[#allocation5 + $0x5e8] sm:$0xff]  ;;  %v1508_v0 = vpack.c.bf16 %v198_v57, %v197_v56  ;;  %v199_v6 = vld [vmem:[#allocation5 + $0x460] sm:$0xff]  ;;  %v444_v56 = vcombine.low %v1782_v23, %v1785_v26 }
  0x68   :  { %1483 = vmatprep.subr.bf16.mxu1 %v1482_v34  ;;  %v445_v34 = vcombine.high %v1782_v23, %v1785_v26  ;;  %v200_v7 = vld [vmem:[#allocation5 + $0x468] sm:$0xff]  ;;  %v231_v62 = vld [vmem:[#allocation5 + $0x560] sm:$0xff]  ;;  %v217_v9 = vld [vmem:[#allocation5 + $0x4f0] sm:$0xff] }
  0x69   :  { %1453 = vmatpush3.bf16.msra.mxu0 %v1452_v40  ;;  %v244_v40 = vld [vmem:[#allocation5 + $0x5c8] sm:$0xff]  ;;  %v249_v12 = vld [vmem:[#allocation5 + $0x5f0] sm:$0xff]  ;;  %v250_v13 = vld [vmem:[#allocation5 + $0x5f8] sm:$0xff]  ;;  %v1512_v14 = vpack.c.bf16 %v200_v7, %v199_v6 }
  0x6a   :  { %1487 = vmatprep.subr.bf16.mxu0 %v1486_v42  ;;  %v1532_v42 = vpack.c.bf16 %v226_v36, %v225_v33  ;;  %v1534_v47 = vpack.c.bf16 %v244_v40, %v243_v39  ;;  %v232_v8 = vld [vmem:[#allocation5 + $0x568] sm:$0xff]  ;;  %v202_v15 = vld [vmem:[#allocation5 + $0x478] sm:$0xff]  ;;  %v267_v24 = vld [vmem:[#allocation5 + $0x680] sm:$0xff] }
  0x6b   :  { %1485 = vmatpush3.bf16.msra.mxu1 %v1484_v41  ;;  %v1500_v41 = vpack.c.bf16 %v194_v32, %v193_v31  ;;  %v234_v17 = vld [vmem:[#allocation5 + $0x578] sm:$0xff]  ;;  %v1544_v18 = vpack.c.bf16 %v232_v8, %v231_v62  ;;  %v299_v33 = vld [vmem:[#allocation5 + $0x780] sm:$0xff]  ;;  %v256_v7 = vld [vmem:[#allocation5 + $0x628] sm:$0xff] }
  0x6c   :  { %1519 = vmatprep.subr.bf16.mxu1 %v1518_v46  ;;  %703 = vmatmul.mubr.f32.vlgmr.msra.gmra.mrb[2].mxu0 %v406_v50  ;;  %v227_v46 = vld [vmem:[#allocation5 + $0x540] sm:$0xff]  ;;  %v214_v50 = vld [vmem:[#allocation5 + $0x4d8] sm:$0xff]  ;;  %v288_v8 = vld [vmem:[#allocation5 + $0x728] sm:$0xff] }
  0x6d   :  { %1489 = vmatpush3.bf16.msra.mxu0 %v1488_v53  ;;  %842 = vmatprep.mubr.f32.mxu0 %v443_v28  ;;  %v1504_v53 = vpack.c.bf16 %v196_v45, %v195_v44  ;;  %v1506_v55 = vpack.c.bf16 %v214_v50, %v213_v49  ;;  %v46_v25 = vld [vmem:[#allocation2 + $0x18] sm:$0xff]  ;;  %v1546_v28 = vpack.c.bf16 %v250_v13, %v249_v12  ;;  %v284_v45 = vld [vmem:[#allocation5 + $0x708] sm:$0xff]  ;;  %v255_v6 = vld [vmem:[#allocation5 + $0x620] sm:$0xff] }
  0x6e   :  { %773 = vmatmul.mubr.f32.vlgmr.msra.gmra.mrb[2].mxu1 %v408_v54  ;;  %1491 = vmatprep.subr.bf16.mxu0 %v1490_v59  ;;  %v1536_v54 = vpack.c.bf16 %v228_v48, %v227_v46  ;;  %v1538_v59 = vpack.c.bf16 %v246_v52, %v245_v51  ;;  %v58_v31 = vld [vmem:[#allocation2 + $0x78] sm:$0xff]  ;;  %v269_v46 = vld [vmem:[#allocation5 + $0x690] sm:$0xff]  ;;  %v442_v50 = vcombine.low %v1776_v21, %v1779_v22  ;;  %v287_v62 = vld [vmem:[#allocation5 + $0x720] sm:$0xff] }
  0x6f   :  { %1521 = vmatpush3.bf16.msra.mxu1 %v1520_v58  ;;  %912 = vmatprep.mubr.f32.mxu1 %v445_v34  ;;  %v229_v58 = vld [vmem:[#allocation5 + $0x550] sm:$0xff]  ;;  %v300_v34 = vld [vmem:[#allocation5 + $0x788] sm:$0xff]  ;;  %v302_v52 = vld [vmem:[#allocation5 + $0x798] sm:$0xff]  ;;  %v1560_v13 = vpack.c.bf16 %v256_v7, %v255_v6 }
  0x70   :  { %1523 = vmatprep.subr.bf16.mxu1 %v1522_v3  ;;  %v247_v3 = vld [vmem:[#allocation5 + $0x5e0] sm:$0xff]  ;;  %v1540_v4 = vpack.c.bf16 %v230_v60, %v229_v58  ;;  %v1582_v44 = vpack.c.bf16 %v300_v34, %v299_v33  ;;  %v301_v51 = vld [vmem:[#allocation5 + $0x790] sm:$0xff]  ;;  %v254_v60 = vld [vmem:[#allocation5 + $0x618] sm:$0xff] }
  0x71   :  { %1493 = vmatpush3.bf16.msra.mxu0 %v1492_v5  ;;  %v1510_v5 = vpack.c.bf16 %v216_v2, %v215_v63  ;;  %v1542_v1 = vpack.c.bf16 %v248_v61, %v247_v3  ;;  %v285_v21 = vld [vmem:[#allocation5 + $0x710] sm:$0xff]  ;;  %v1586_v22 = vpack.c.bf16 %v302_v52, %v301_v51  ;;  %v286_v63 = vld [vmem:[#allocation5 + $0x718] sm:$0xff]  ;;  %v271_v2 = vld [vmem:[#allocation5 + $0x6a0] sm:$0xff] }
  0x72   :  { %1495 = vmatprep.subr.bf16.mxu0 %v1494_v11  ;;  %v201_v11 = vld [vmem:[#allocation5 + $0x470] sm:$0xff]  ;;  %v272_v3 = vld [vmem:[#allocation5 + $0x6a8] sm:$0xff]  ;;  %v303_v61 = vld [vmem:[#allocation5 + $0x7a0] sm:$0xff] }
  0x73   :  { %1525 = vmatpush3.bf16.msra.mxu1 %v1524_v10  ;;  %v218_v10 = vld [vmem:[#allocation5 + $0x4f8] sm:$0xff]  ;;  %v1516_v38 = vpack.c.bf16 %v202_v15, %v201_v11  ;;  %v305_v11 = vld [vmem:[#allocation5 + $0x7b0] sm:$0xff]  ;;  %v259_v33 = vld [vmem:[#allocation5 + $0x640] sm:$0xff] }
  0x74   :  { %1527 = vmatprep.subr.bf16.mxu1 %v1526_v16  ;;  %v233_v16 = vld [vmem:[#allocation5 + $0x570] sm:$0xff]  ;;  %v1514_v19 = vpack.c.bf16 %v218_v10, %v217_v9  ;;  %v274_v10 = vld [vmem:[#allocation5 + $0x6b8] sm:$0xff]  ;;  %v260_v34 = vld [vmem:[#allocation5 + $0x648] sm:$0xff] }
  0x75   :  { %1497 = vmatpush3.bf16.msra.mxu0 %v1496_v27  ;;  %v50_v27 = vld [vmem:[#allocation2 + $0x38] sm:$0xff]  ;;  %v1548_v39 = vpack.c.bf16 %v234_v17, %v233_v16  ;;  %v273_v9 = vld [vmem:[#allocation5 + $0x6b0] sm:$0xff]  ;;  %v279_v52 = vld [vmem:[#allocation5 + $0x6e0] sm:$0xff] }
  0x76   :  { %1499 = vmatprep.subr.bf16.mxu0 %v1498_v30  ;;  %v54_v30 = vld [vmem:[#allocation2 + $0x58] sm:$0xff]  ;;  %v446_v32 = vcombine.low %v46_v25, %v50_v27  ;;  %v447_v36 = vcombine.high %v46_v25, %v50_v27  ;;  %v1562_v15 = vpack.c.bf16 %v274_v10, %v273_v9  ;;  %v257_v16 = vld [vmem:[#allocation5 + $0x630] sm:$0xff]  ;;  %v275_v25 = vld [vmem:[#allocation5 + $0x6c0] sm:$0xff] }
  0x77   :  { %1529 = vmatpush3.bf16.msra.mxu1 %v1528_v29  ;;  %v268_v29 = vld [vmem:[#allocation5 + $0x688] sm:$0xff]  ;;  %v449_v37 = vcombine.high %v54_v30, %v58_v31  ;;  %v306_v12 = vld [vmem:[#allocation5 + $0x7b8] sm:$0xff]  ;;  %v265_v6 = vld [vmem:[#allocation5 + $0x670] sm:$0xff] }
  0x78   :  { %1531 = vmatprep.subr.bf16.mxu1 %v1530_v35  ;;  %v448_v35 = vcombine.low %v54_v30, %v58_v31  ;;  %v1550_v40 = vpack.c.bf16 %v268_v29, %v267_v24  ;;  %v1792_v48 = vrot.slane %v446_v32, %v1749_v20  ;;  %v258_v17 = vld [vmem:[#allocation5 + $0x638] sm:$0xff]  ;;  %v276_v27 = vld [vmem:[#allocation5 + $0x6c8] sm:$0xff] }
  0x79   :  { %1501 = vmatpush3.bf16.msra.mxu0 %v1500_v41  ;;  %v251_v41 = vld [vmem:[#allocation5 + $0x600] sm:$0xff]  ;;  %v290_v24 = vld [vmem:[#allocation5 + $0x738] sm:$0xff]  ;;  %v308_v29 = vld [vmem:[#allocation5 + $0x7c8] sm:$0xff]  ;;  %v1564_v30 = vpack.c.bf16 %v258_v17, %v257_v16  ;;  %v1566_v32 = vpack.c.bf16 %v276_v27, %v275_v25 }
  0x7a   :  { %1503 = vmatprep.subr.bf16.mxu0 %v1502_v43  ;;  %v283_v43 = vld [vmem:[#allocation5 + $0x700] sm:$0xff]  ;;  %v1795_v49 = vrot.slane %v448_v35, %v1749_v20  ;;  %v294_v51 = vld [vmem:[#allocation5 + $0x758] sm:$0xff] }
  0x7b   :  { %1533 = vmatpush3.bf16.msra.mxu1 %v1532_v42  ;;  %v252_v42 = vld [vmem:[#allocation5 + $0x608] sm:$0xff]  ;;  %v1584_v57 = vpack.c.bf16 %v284_v45, %v283_v43  ;;  %v291_v35 = vld [vmem:[#allocation5 + $0x740] sm:$0xff]  ;;  %v261_v45 = vld [vmem:[#allocation5 + $0x650] sm:$0xff] }
  0x7c   :  { %1535 = vmatprep.subr.bf16.mxu1 %v1534_v47  ;;  %v270_v47 = vld [vmem:[#allocation5 + $0x698] sm:$0xff] }
  0x7d   :  { %1505 = vmatpush3.bf16.msra.mxu0 %v1504_v53  ;;  %v1800_v53 = vrot.slane %v447_v36, %v1749_v20  ;;  %v1554_v58 = vpack.c.bf16 %v270_v47, %v269_v46  ;;  %v262_v46 = vld [vmem:[#allocation5 + $0x658] sm:$0xff]  ;;  %v293_v47 = vld [vmem:[#allocation5 + $0x750] sm:$0xff] }
  0x7e   :  { %1507 = vmatprep.subr.bf16.mxu0 %v1506_v55  ;;  %v1552_v55 = vpack.c.bf16 %v252_v42, %v251_v41  ;;  %v310_v41 = vld [vmem:[#allocation5 + $0x7d8] sm:$0xff]  ;;  %v1568_v42 = vpack.c.bf16 %v260_v34, %v259_v33 }
  0x7f   :  { %1537 = vmatpush3.bf16.msra.mxu1 %v1536_v54  ;;  %v1803_v54 = vrot.slane %v449_v37, %v1749_v20  ;;  %v479_v20 = vcombine.high %v1792_v48, %v1795_v49  ;;  %v292_v37 = vld [vmem:[#allocation5 + $0x748] sm:$0xff]  ;;  %v266_v7 = vld [vmem:[#allocation5 + $0x678] sm:$0xff] }
  0x80   :  { %1539 = vmatprep.subr.bf16.mxu1 %v1538_v59  ;;  %v253_v59 = vld [vmem:[#allocation5 + $0x610] sm:$0xff]  ;;  %v1600_v43 = vpack.c.bf16 %v292_v37, %v291_v35  ;;  %v1580_v9 = vpack.c.bf16 %v266_v7, %v265_v6 }
  0x81   :  { %1509 = vmatpush3.bf16.msra.mxu0 %v1508_v0  ;;  %v304_v0 = vld [vmem:[#allocation5 + $0x7a8] sm:$0xff]  ;;  %v481_v23 = vcombine.high %v1800_v53, %v1803_v54  ;;  %v1556_v26 = vpack.c.bf16 %v254_v60, %v253_v59  ;;  %v1604_v59 = vpack.c.bf16 %v294_v51, %v293_v47 }
  0x82   :  { %1511 = vmatprep.subr.bf16.mxu0 %v1510_v5  ;;  %v1558_v5 = vpack.c.bf16 %v272_v3, %v271_v2  ;;  %v296_v3 = vld [vmem:[#allocation5 + $0x768] sm:$0xff] }
  0x83   :  { %1541 = vmatpush3.bf16.msra.mxu1 %v1540_v4  ;;  %v1588_v4 = vpack.c.bf16 %v286_v63, %v285_v21  ;;  %v263_v21 = vld [vmem:[#allocation5 + $0x660] sm:$0xff] }
  0x84   :  { %1543 = vmatprep.subr.bf16.mxu1 %v1542_v1  ;;  %v1590_v1 = vpack.c.bf16 %v304_v0, %v303_v61  ;;  %v295_v63 = vld [vmem:[#allocation5 + $0x760] sm:$0xff]  ;;  %v282_v61 = vld [vmem:[#allocation5 + $0x6f8] sm:$0xff]  ;;  %v313_v0 = vld [vmem:[#allocation5 + $0x7f0] sm:$0xff] }
  0x85   :  { %1513 = vmatpush3.bf16.msra.mxu0 %v1512_v14  ;;  %v1592_v14 = vpack.c.bf16 %v288_v8, %v287_v62  ;;  %v298_v8 = vld [vmem:[#allocation5 + $0x778] sm:$0xff] }
  0x86   :  { %1515 = vmatprep.subr.bf16.mxu0 %v1514_v19  ;;  %v1594_v19 = vpack.c.bf16 %v306_v12, %v305_v11  ;;  %v478_v11 = vcombine.low %v1792_v48, %v1795_v49  ;;  %v480_v12 = vcombine.low %v1800_v53, %v1803_v54 }
  0x87   :  { %1545 = vmatpush3.bf16.msra.mxu1 %v1544_v18  ;;  %v289_v18 = vld [vmem:[#allocation5 + $0x730] sm:$0xff] }
  0x88   :  { %1547 = vmatprep.subr.bf16.mxu1 %v1546_v28  ;;  %v307_v28 = vld [vmem:[#allocation5 + $0x7c0] sm:$0xff]  ;;  %v1596_v31 = vpack.c.bf16 %v290_v24, %v289_v18 }
  0x89   :  { %1517 = vmatpush3.bf16.msra.mxu0 %v1516_v38  ;;  %v1598_v36 = vpack.c.bf16 %v308_v29, %v307_v28  ;;  %v277_v38 = vld [vmem:[#allocation5 + $0x6d0] sm:$0xff] }
  0x8a   :  { %1551 = vmatprep.subr.bf16.mxu0 %v1550_v40  ;;  %v309_v40 = vld [vmem:[#allocation5 + $0x7d0] sm:$0xff] }
  0x8b   :  { %1549 = vmatpush3.bf16.msra.mxu1 %v1548_v39  ;;  %v278_v39 = vld [vmem:[#allocation5 + $0x6d8] sm:$0xff] }
  0x8c   :  { %1583 = vmatprep.subr.bf16.mxu1 %v1582_v44  ;;  %843 = vmatmul.mubr.f32.vlgmr.msra.gmra.mrb[4].mxu0 %v442_v50  ;;  %v1570_v44 = vpack.c.bf16 %v278_v39, %v277_v38  ;;  %v1602_v50 = vpack.c.bf16 %v310_v41, %v309_v40 }
  0x8d   :  { %1553 = vmatpush3.bf16.msra.mxu0 %v1552_v55  ;;  %982 = vmatprep.mubr.f32.mxu0 %v479_v20  ;;  %v280_v55 = vld [vmem:[#allocation5 + $0x6e8] sm:$0xff]  ;;  %v281_v20 = vld [vmem:[#allocation5 + $0x6f0] sm:$0xff] }
  0x8e   :  { %913 = vmatmul.mubr.f32.vlgmr.msra.gmra.mrb[4].mxu1 %v444_v56  ;;  %1555 = vmatprep.subr.bf16.mxu0 %v1554_v58  ;;  %v311_v56 = vld [vmem:[#allocation5 + $0x7e0] sm:$0xff]  ;;  %v1572_v58 = vpack.c.bf16 %v262_v46, %v261_v45  ;;  %v1574_v60 = vpack.c.bf16 %v280_v55, %v279_v52 }
  0x8f   :  { %1585 = vmatpush3.bf16.msra.mxu1 %v1584_v57  ;;  %1052 = vmatprep.mubr.f32.mxu1 %v481_v23  ;;  %v312_v57 = vld [vmem:[#allocation5 + $0x7e8] sm:$0xff]  ;;  %v314_v23 = vld [vmem:[#allocation5 + $0x7f8] sm:$0xff] }
  0x90   :  { %1587 = vmatprep.subr.bf16.mxu1 %v1586_v22  ;;  %v264_v22 = vld [vmem:[#allocation5 + $0x668] sm:$0xff]  ;;  %v1606_v2 = vpack.c.bf16 %v312_v57, %v311_v56  ;;  %v1610_v62 = vpack.c.bf16 %v314_v23, %v313_v0 }
  0x91   :  { %1557 = vmatpush3.bf16.msra.mxu0 %v1556_v26  ;;  %v1576_v26 = vpack.c.bf16 %v264_v22, %v263_v21 }
  0x92   :  { %1559 = vmatprep.subr.bf16.mxu0 %v1558_v5  ;;  %v1578_v5 = vpack.c.bf16 %v282_v61, %v281_v20 }
  0x93   :  { %1589 = vmatpush3.bf16.msra.mxu1 %v1588_v4  ;;  %v1608_v4 = vpack.c.bf16 %v296_v3, %v295_v63 }
  0x94   :  { %1591 = vmatprep.subr.bf16.mxu1 %v1590_v1  ;;  %v297_v1 = vld [vmem:[#allocation5 + $0x770] sm:$0xff] }
  0x95   :  { %1561 = vmatpush3.bf16.msra.mxu0 %v1560_v13  ;;  %v1612_v10 = vpack.c.bf16 %v298_v8, %v297_v1 }
  0x96   :  { %1563 = vmatprep.subr.bf16.mxu0 %v1562_v15 }
  0x97   :  { %1593 = vmatpush3.bf16.msra.mxu1 %v1592_v14  ;;  %v1077_v14 = vld [vmem:[%s1834_s2] ss:$0 sm:$0xff] }
  0x98   :  { %1595 = vmatprep.subr.bf16.mxu1 %v1594_v19 }
  0x99   :  { %1565 = vmatpush3.bf16.msra.mxu0 %v1564_v30 }
  0x9a   :  { %1567 = vmatprep.subr.bf16.mxu0 %v1566_v32 }
  0x9b   :  { %1597 = vmatpush3.bf16.msra.mxu1 %v1596_v31 }
  0x9c   :  { %1599 = vmatprep.subr.bf16.mxu1 %v1598_v36 }
  0x9d   :  { %1569 = vmatpush3.bf16.msra.mxu0 %v1568_v42 }
  0x9e   :  { %1571 = vmatprep.subr.bf16.mxu0 %v1570_v44 }
  0x9f   :  { %1601 = vmatpush3.bf16.msra.mxu1 %v1600_v43 }
  0xa0   :  { %1603 = vmatprep.subr.bf16.mxu1 %v1602_v50 }
  0xa1   :  { %1573 = vmatpush3.bf16.msra.mxu0 %v1572_v58 }
  0xa2   :  { %1575 = vmatprep.subr.bf16.mxu0 %v1574_v60 }
  0xa3   :  { %1605 = vmatpush3.bf16.msra.mxu1 %v1604_v59 }
  0xa4   :  { %1607 = vmatprep.subr.bf16.mxu1 %v1606_v2 }
  0xa5   :  { %1577 = vmatpush3.bf16.msra.mxu0 %v1576_v26 }
  0xa6   :  { %1579 = vmatprep.subr.bf16.mxu0 %v1578_v5 }
  0xa7   :  { %1609 = vmatpush3.bf16.msra.mxu1 %v1608_v4 }
  0xa8   :  { %1611 = vmatprep.subr.bf16.mxu1 %v1610_v62 }
  0xa9   :  { %1581 = vmatpush3.bf16.msra.mxu0 %v1580_v9 }
  0xab   :  { %1613 = vmatpush3.bf16.msra.mxu1 %v1612_v10 }
  0xac   :  { %983 = vmatmul.mubr.f32.vlgmr.msra.gmra.mrb[6].mxu0 %v478_v11 }
  0xae   :  { %1053 = vmatmul.mubr.f32.vlgmr.msra.gmra.mrb[6].mxu1 %v480_v12 }
 0x11f   :  { %v1110_v13 = vpop.f32.mrb[0].mxu0 }
 0x120   :  { %v1111_v15 = vpop.f32.mrb[1].mxu0 }
 0x121   :  { %v1145_v16 = vpop.f32.mrb[0].mxu1  ;;  %v1112_v17 = vadd.f32 %v1111_v15, %v1110_v13 }
 0x122   :  { %v1146_v18 = vpop.f32.mrb[1].mxu1 }
 0x123   :  { %v1147_v19 = vadd.f32 %v1146_v18, %v1145_v16  ;;  %v565_v24 = vadd.f32 %v1112_v17, %v1077_v14 }
 0x125   :  { %v635_v25 = vadd.f32 %v1147_v19, %v565_v24 }
 0x13f   :  { %v1180_v48 = vpop.f32.mrb[2].mxu0 }
 0x140   :  { %v1181_v49 = vpop.f32.mrb[3].mxu0 }
 0x141   :  { %v1215_v27 = vpop.f32.mrb[2].mxu1  ;;  %v1182_v28 = vadd.f32 %v1181_v49, %v1180_v48 }
 0x142   :  { %v1216_v53 = vpop.f32.mrb[3].mxu1 }
 0x143   :  { %v1217_v54 = vadd.f32 %v1216_v53, %v1215_v27  ;;  %v705_v29 = vadd.f32 %v1182_v28, %v635_v25 }
 0x145   :  { %v775_v30 = vadd.f32 %v1217_v54, %v705_v29 }
 0x15f   :  { %v1250_v31 = vpop.f32.mrb[4].mxu0 }
 0x160   :  { %v1251_v32 = vpop.f32.mrb[5].mxu0 }
 0x161   :  { %v1285_v33 = vpop.f32.mrb[4].mxu1  ;;  %v1252_v34 = vadd.f32 %v1251_v32, %v1250_v31 }
 0x162   :  { %v1286_v35 = vpop.f32.mrb[5].mxu1 }
 0x163   :  { %v1287_v36 = vadd.f32 %v1286_v35, %v1285_v33  ;;  %v845_v37 = vadd.f32 %v1252_v34, %v775_v30 }
 0x165   :  { %v915_v38 = vadd.f32 %v1287_v36, %v845_v37 }
 0x17f   :  { %v1320_v39 = vpop.f32.mrb[6].mxu0 }
 0x180   :  { %v1321_v40 = vpop.f32.mrb[7].mxu0 }
 0x181   :  { %v1355_v41 = vpop.f32.mrb[6].mxu1  ;;  %v1322_v42 = vadd.f32 %v1321_v40, %v1320_v39 }
 0x182   :  { %v1356_v43 = vpop.f32.mrb[7].mxu1 }
 0x183   :  { %v1357_v44 = vadd.f32 %v1356_v43, %v1355_v41  ;;  %v985_v45 = vadd.f32 %v1322_v42, %v915_v38 }
 0x185   :  { %v1055_v46 = vadd.f32 %v1357_v44, %v985_v45 }
 0x187   :  { %1058 = vst [vmem:[#allocation7] sm:$0xff] %v1055_v46 }
 0x188   :  { %1063 = vsyncadd [#allocation4], 96  ;;  %s1702_s2 = smov [#allocation7]  }
 0x189   :  { %s1064_s14 = sshll.u32 %s1702_s2, 4  ;;  %s1065_s14 = int_to_ptr.vmem [resolvable:$true] %s1064_s14 }
 0x18a   :  { %s1667_s15 = scalar_lea.vmem %s1065_s14, 32  ;;  %s1671_s16 = scalar_lea.vmem %s1065_s14, 128 }
 0x18b   :  { %p1668_p2 = scmp.ne.s32.totalorder %s1065_s14, %s1667_s15  ;;  %p1672_p3 = scmp.lt.s32.totalorder %s1065_s14, %s1065_s14 }
 0x18c   :  { %p1673_p4 = scmp.lt.s32.totalorder %s1671_s16, %s1667_s15 }
 0x18e   :  { %p1674_p5 = por %p1673_p4, %p1672_p3 }
 0x190   :  { %p1675_p6 = pnand %p1674_p5, %p1668_p2 }
 0x192   :  { %1678 = shalt.err (!%p1675_p6)
}
 0x193   :  { %s1679_s19 = scalar_lea.hbm %s1835_s3, 32 }
 0x194   :  { %p1680_p7 = scmp.ne.s32.totalorder %s1835_s3, %s1679_s19  ;;  %p1683_p8 = scmp.lt.u32.totalorder %s1679_s19, %s1835_s3 }
 0x196   :  { %p1685_p9 = pnand %p1683_p8, %p1680_p7 }
 0x198   :  { %1688 = shalt.err (!%p1685_p9)
}
 0x199   :  { %s1703_s25 = smov 2  }
 0x19a   :  { %1070 = dma.vmem_to_hbm [thread:$0]  %s1065_s14, 32, %s1835_s3, [#allocation4], %s1697_s24, %s1697_s24, %s1703_s25  }
 0x19b   :  { %1693 = dma.done.wait [#allocation4], 128  }
 0x19c   :  { %1694 = vsyncadd [#allocation4], 4294967168 }
 0x19d   :  { %1074 = vsyncpa [#allocation3], 1 }
 0x19e   :  { %1075 = vsyncpa [#allocation6], 1 }
 0x19f   :  { %1076 = vsyncpa [#allocation4], 1 }

</bundles_post_ra>
